<compile_context>
chip_gen: v7x
topology: tpu7x:2x2x1
jax: 0.10.0
libtpu: 0.0.40
codegen_flags: <defaults>
</compile_context>

<pallas_src>
import jax
import jax.numpy as jnp
from jax.experimental import pallas as pl
from jax.experimental.pallas import tpu as pltpu

_MIB = 1024 * 1024


def _round_up(n: int, m: int) -> int:
    return ((n + m - 1) // m) * m


def _sublane_multiple(dtype) -> int:
    # f32 -> 8, bf16 -> 16, int8/fp8 -> 32 (packed sublanes).
    return max(8, 32 // jnp.dtype(dtype).itemsize)


def _vmem_limits():
    """Per-generation scoped-VMEM limit and the budget tiles are sized against."""
    cap = 128 * _MIB
    try:
        info = pltpu.get_tpu_info()
        cap = int(getattr(info, "vmem_capacity_bytes", cap))
    except Exception:
        pass
    if cap <= 64 * _MIB:      # v7x: 64 MiB physical per TensorCore
        limit = 48 * _MIB
    else:                     # v5e / v6e: 128 MiB physical
        limit = 96 * _MIB
    budget = limit - 8 * _MIB  # headroom for compiler-internal scratch
    return limit, budget


# --------------------------------------------------------------------------
# Kernels
# --------------------------------------------------------------------------
def _gated_residual_fused_kernel(gate_ref, x_ref, w_ref, b_ref, o_ref):
    """One row-tile, full C: y = x @ W + b;  out = y + g*(x - y)."""
    g = gate_ref[0, 0]                      # sigmoid(alpha), precomputed (SMEM)
    x = x_ref[...]
    y = jnp.dot(x.astype(w_ref.dtype), w_ref[...],
                preferred_element_type=jnp.float32)
    y = y + b_ref[...]                      # bias kept in f32 (no double-rounding)
    xf = x.astype(jnp.float32)
    o_ref[...] = (y + g * (xf - y)).astype(o_ref.dtype)


def _gated_residual_tiled_kernel(gate_ref, xk_ref, w_ref, b_ref, xj_ref,
                                 o_ref, acc_ref):
    """(i, j, k) grid: accumulate x_tile @ W_tile over k, blend in the epilogue."""
    k = pl.program_id(2)

    @pl.when(k == 0)
    def _():
        acc_ref[...] = jnp.zeros_like(acc_ref)

    acc_ref[...] += jnp.dot(xk_ref[...].astype(w_ref.dtype), w_ref[...],
                            preferred_element_type=jnp.float32)

    @pl.when(k == pl.num_programs(2) - 1)
    def _():
        g = gate_ref[0, 0]
        y = acc_ref[...] + b_ref[...]
        xf = xj_ref[...].astype(jnp.float32)
        o_ref[...] = (y + g * (xf - y)).astype(o_ref.dtype)


# --------------------------------------------------------------------------
# Wrapper
# --------------------------------------------------------------------------
def gated_residual_forward(x: jax.Array, w: jax.Array, b: jax.Array,
                           alpha: jax.Array, *,
                           block_m: int | None = None,
                           block_n: int | None = None,
                           block_k: int | None = None,
                           matmul_dtype=None,
                           force_tiled: bool = False) -> jax.Array:
    """GatedResidual forward: sigmoid(alpha)*x + (1-sigmoid(alpha))*(x@W + b).

    matmul_dtype: optionally cast x/W to bf16 for the MXU (f32 accumulation);
    default None preserves the input precision.
    """
    orig_shape = x.shape
    C = orig_shape[-1]
    assert w.shape == (C, C), "sublayer must preserve the feature size"
    M = x.size // C

    x2 = x.reshape(M, C)
    if matmul_dtype is not None:
        w = w.astype(matmul_dtype)
    b2 = b.reshape(1, C).astype(jnp.float32)                    # f32 bias
    gate2 = jax.nn.sigmoid(jnp.asarray(alpha, jnp.float32)).reshape(1, 1)

    x_item = jnp.dtype(x.dtype).itemsize
    w_item = jnp.dtype(w.dtype).itemsize
    sub = _sublane_multiple(x.dtype)
    vmem_limit, vmem_budget = _vmem_limits()

    cost = pl.CostEstimate(
        flops=2 * M * C * C,
        transcendentals=0,
        bytes_accessed=2 * M * C * x_item + C * C * w_item + C * 4,
    )
    # Cap row tiles so the grid has >= 2 steps (both v7x TensorCores get work).
    two_core_cap = max(sub, _round_up(pl.cdiv(M, 2), sub))

    # ---------- path selection (W + b now included in the VMEM budget) -------
    can_tile_k = (C % 128 == 0)
    per_row = 2 * C * x_item + 2 * C * x_item        # x tile + out tile, double-buffered
    avail = vmem_budget - 2 * C * C * w_item - 2 * C * 4   # conservative: 2x W, 2x b
    max_rows = avail // per_row if avail > 0 else 0
    fused_fits = max_rows >= sub
    use_fused = (fused_fits or not can_tile_k) and not (force_tiled and can_tile_k)
    # TODO(synk): if C is not a multiple of 128 AND W does not fit in VMEM we still
    # take the fused path (no clean K-tiling for ragged C here).

    if use_fused:
        if block_m is not None:
            bm = block_m
        elif fused_fits:
            row_cap = 2048 if M >= 8 * 2048 else 1024
            bm = min(row_cap, max_rows, _round_up(M, sub), two_core_cap)
            bm = max(sub, (bm // sub) * sub)
        else:
            bm = sub

        def _call(single_buffer_w: bool):
            # Grid-invariant W / b need no double-buffering -> reclaim VMEM.
            pm = {"pipeline_mode": pl.Buffered(1)} if single_buffer_w else {}
            grid_spec = pltpu.PrefetchScalarGridSpec(
                num_scalar_prefetch=0,
                grid=(pl.cdiv(M, bm),),
                in_specs=[
                    pl.BlockSpec(memory_space=pltpu.MemorySpace.SMEM),   # gate
                    pl.BlockSpec((bm, C), lambda i: (i, 0)),             # x rows
                    pl.BlockSpec((C, C), lambda i: (0, 0), **pm),        # W resident
                    pl.BlockSpec((1, C), lambda i: (0, 0), **pm),        # b resident
                ],
                out_specs=pl.BlockSpec((bm, C), lambda i: (i, 0)),
            )
            return pl.pallas_call(
                _gated_residual_fused_kernel,
                out_shape=jax.ShapeDtypeStruct((M, C), x.dtype),
                grid_spec=grid_spec,
                compiler_params=pltpu.CompilerParams(
                    dimension_semantics=("parallel",),
                    vmem_limit_bytes=vmem_limit),
                cost_estimate=cost,
            )(gate2, x2, w, b2)

        try:
            out2 = _call(True)
        except Exception:
            out2 = _call(False)   # single-buffer hint unsupported -> default pipelining
        return out2.reshape(orig_shape)

    # ---------- tiled path: (M//tm, C//tn, C//tk) grid + f32 accumulator -----
    tn = block_n if block_n is not None else min(512, C)
    while C % tn:
        tn //= 2
    tk = block_k if block_k is not None else tn
    while C % tk:
        tk //= 2
    assert C % tn == 0 and C % tk == 0

    if block_m is not None:
        tm = block_m
    else:
        avail_t = vmem_budget - 2 * tk * tn * w_item - 2 * tn * 4
        per_row_t = 2 * tk * x_item + 2 * tn * x_item + 2 * tn * x_item + tn * 4
        max_rows_t = max(sub, avail_t // per_row_t)
        tm = min(512, max_rows_t, _round_up(M, sub), two_core_cap)
        tm = max(sub, (tm // sub) * sub)

    grid = (pl.cdiv(M, tm), C // tn, C // tk)
    out2 = pl.pallas_call(
        _gated_residual_tiled_kernel,
        out_shape=jax.ShapeDtypeStruct((M, C), x.dtype),
        grid_spec=pltpu.PrefetchScalarGridSpec(
            num_scalar_prefetch=0,
            grid=grid,
            in_specs=[
                pl.BlockSpec(memory_space=pltpu.MemorySpace.SMEM),       # gate
                pl.BlockSpec((tm, tk), lambda i, j, k: (i, k)),          # x (K slice)
                pl.BlockSpec((tk, tn), lambda i, j, k: (k, j)),          # W tile
                pl.BlockSpec((1, tn), lambda i, j, k: (0, j)),           # b tile
                pl.BlockSpec((tm, tn), lambda i, j, k: (i, j)),          # x (blend slice)
            ],
            out_specs=pl.BlockSpec((tm, tn), lambda i, j, k: (i, j)),
            scratch_shapes=[pltpu.VMEM((tm, tn), jnp.float32)],
        ),
        compiler_params=pltpu.CompilerParams(
            dimension_semantics=("parallel", "parallel", "arbitrary"),
            vmem_limit_bytes=vmem_limit),
        cost_estimate=cost,
    )(gate2, x2, w, b2, x2)
    return out2.reshape(orig_shape)


# --------------------------------------------------------------------------
# Self-test
# --------------------------------------------------------------------------
if __name__ == "__main__":
    key = jax.random.PRNGKey(0)
    kx, kw, kb, kx2, kw2, kb2 = jax.random.split(key, 6)

    def reference(x, w, b, alpha):
        gate = jax.nn.sigmoid(alpha.astype(jnp.float32))[0]
        y = jnp.einsum("...c,cd->...d", x.astype(jnp.float32),
                       w.astype(jnp.float32)) + b.astype(jnp.float32)
        return (gate * x.astype(jnp.float32) + (1.0 - gate) * y).astype(x.dtype)

    # 1) Fused path: (T, N, C) = (8, 2, 128), f32, W resident in VMEM.
    T, N, C = 8, 2, 128
    x = jax.random.normal(kx, (T, N, C), dtype=jnp.float32)
    w = jax.random.normal(kw, (C, C), dtype=jnp.float32) / jnp.sqrt(C)
    b = 0.1 * jax.random.normal(kb, (C,), dtype=jnp.float32)
    alpha = jnp.array([0.25], dtype=jnp.float32)

    y = gated_residual_forward(x, w, b, alpha)
    jax.block_until_ready(y)
    expected = reference(x, w, b, alpha)
    assert y.shape == x.shape and y.dtype == x.dtype
    err1 = float(jnp.max(jnp.abs(y - expected)))
    assert bool(jnp.allclose(y, expected, rtol=2e-2, atol=2e-2)), f"fused max_err={err1}"

    # 2) Tiled path (forced): (T, N, C) = (4, 6, 256) with 128-tiles so the K axis
    #    exercises the accumulator + pl.when epilogue (2 accumulation steps).
    T2, N2, C2 = 4, 6, 256
    x_t = jax.random.normal(kx2, (T2, N2, C2), dtype=jnp.float32)
    w_t = jax.random.normal(kw2, (C2, C2), dtype=jnp.float32) / jnp.sqrt(C2)
    b_t = 0.1 * jax.random.normal(kb2, (C2,), dtype=jnp.float32)
    alpha_t = jnp.array([-0.5], dtype=jnp.float32)

    y_t = gated_residual_forward(x_t, w_t, b_t, alpha_t, force_tiled=True,
                                 block_m=8, block_n=128, block_k=128)
    jax.block_until_ready(y_t)
    expected_t = reference(x_t, w_t, b_t, alpha_t)
    assert y_t.shape == x_t.shape and y_t.dtype == x_t.dtype
    err2 = float(jnp.max(jnp.abs(y_t - expected_t)))
    assert bool(jnp.allclose(y_t, expected_t, rtol=2e-2, atol=2e-2)), f"tiled max_err={err2}"

    print("KERNEL_OK")
</pallas_src>

<mosaic_0001>
module attributes {stable_mosaic.version = 11 : i64} {
  func.func @_gated_residual_fused_kernel(%arg0: i32, %arg1: memref<1x1xf32, #tpu.memory_space<smem>>, %arg2: memref<8x128xf32, #tpu.memory_space<vmem>>, %arg3: memref<128x128xf32, #tpu.memory_space<vmem>>, %arg4: memref<1x128xf32, #tpu.memory_space<vmem>>, %arg5: memref<8x128xf32, #tpu.memory_space<vmem>>) attributes {dimension_semantics = [#tpu.dimension_semantics<parallel>], iteration_bounds = array<i64: 2>, scalar_prefetch = 0 : i64, scratch_operands = 0 : i64, tpu.core_type = #tpu.core_type<tc>, window_params = [{transform_indices = @transform_0, window_bounds = array<i64: 1, 1>}, {transform_indices = @transform_1, window_bounds = array<i64: 8, 128>}, {pipeline_mode = #tpu.pipeline_mode<synchronous>, transform_indices = @transform_2, window_bounds = array<i64: 128, 128>}, {pipeline_mode = #tpu.pipeline_mode<synchronous>, transform_indices = @transform_3, window_bounds = array<i64: 1, 128>}, {transform_indices = @transform_4, window_bounds = array<i64: 8, 128>}]} {
    %c0 = arith.constant 0 : index
    %c0_0 = arith.constant 0 : index
    %0 = memref.load %arg1[%c0, %c0_0] : memref<1x1xf32, #tpu.memory_space<smem>>
    %c0_1 = arith.constant 0 : index
    %c0_2 = arith.constant 0 : index
    %1 = vector.load %arg2[%c0_1, %c0_2] : memref<8x128xf32, #tpu.memory_space<vmem>>, vector<8x128xf32>
    %c0_3 = arith.constant 0 : index
    %c0_4 = arith.constant 0 : index
    %2 = vector.load %arg3[%c0_3, %c0_4] : memref<128x128xf32, #tpu.memory_space<vmem>>, vector<128x128xf32>
    %cst = arith.constant dense<0.000000e+00> : vector<8x128xf32>
    %3 = tpu.matmul %1, %2, %cst {dimension_numbers = #tpu.dot_dimension_numbers<[1], [0], [0], [1], [0, 0, 1, 1], [], []>} : vector<8x128xf32>, vector<128x128xf32>, vector<8x128xf32> -> vector<8x128xf32>
    %c0_5 = arith.constant 0 : index
    %c0_6 = arith.constant 0 : index
    %4 = vector.load %arg4[%c0_5, %c0_6] : memref<1x128xf32, #tpu.memory_space<vmem>>, vector<1x128xf32>
    %5 = vector.broadcast %4 : vector<1x128xf32> to vector<8x128xf32>
    %6 = arith.addf %3, %5 : vector<8x128xf32>
    %7 = arith.subf %1, %6 : vector<8x128xf32>
    %8 = vector.broadcast %0 : f32 to vector<8x128xf32>
    %9 = arith.mulf %8, %7 : vector<8x128xf32>
    %10 = arith.addf %6, %9 : vector<8x128xf32>
    %c0_7 = arith.constant 0 : index
    %c0_8 = arith.constant 0 : index
    %11 = vector.load %arg5[%c0_7, %c0_8] : memref<8x128xf32, #tpu.memory_space<vmem>>, vector<8x128xf32>
    tpu.vector_store %arg5[%c0_7, %c0_8], %10 {strides = array<i32>} : memref<8x128xf32, #tpu.memory_space<vmem>>, vector<8x128xf32>,
    return
  }
  func.func @transform_0(%arg0: i32) -> (i32, i32) {
    %c0_i32 = arith.constant 0 : i32
    %c0_i32_0 = arith.constant 0 : i32
    %c0_i32_1 = arith.constant 0 : i32
    return %c0_i32, %c0_i32_0 : i32, i32
  }
  func.func @transform_1(%arg0: i32) -> (i32, i32) {
    %c0_i32 = arith.constant 0 : i32
    %c0_i32_0 = arith.constant 0 : i32
    return %arg0, %c0_i32 : i32, i32
  }
  func.func @transform_2(%arg0: i32) -> (i32, i32) {
    %c0_i32 = arith.constant 0 : i32
    %c0_i32_0 = arith.constant 0 : i32
    %c0_i32_1 = arith.constant 0 : i32
    return %c0_i32, %c0_i32_0 : i32, i32
  }
  func.func @transform_3(%arg0: i32) -> (i32, i32) {
    %c0_i32 = arith.constant 0 : i32
    %c0_i32_0 = arith.constant 0 : i32
    %c0_i32_1 = arith.constant 0 : i32
    return %c0_i32, %c0_i32_0 : i32, i32
  }
  func.func @transform_4(%arg0: i32) -> (i32, i32) {
    %c0_i32 = arith.constant 0 : i32
    %c0_i32_0 = arith.constant 0 : i32
    return %arg0, %c0_i32 : i32, i32
  }
}

module attributes {stable_mosaic.version = 11 : i64} {
  func.func @_gated_residual_fused_kernel(%arg0: i32, %arg1: memref<1x1xf32, #tpu.memory_space<smem>>, %arg2: memref<8x128xf32, #tpu.memory_space<vmem>>, %arg3: memref<128x128xf32, #tpu.memory_space<vmem>>, %arg4: memref<1x128xf32, #tpu.memory_space<vmem>>, %arg5: memref<8x128xf32, #tpu.memory_space<vmem>>) attributes {dimension_semantics = [#tpu.dimension_semantics<parallel>], iteration_bounds = array<i64: 2>, scalar_prefetch = 0 : i64, scratch_operands = 0 : i64, tpu.core_type = #tpu.core_type<tc>, window_params = [{transform_indices = @transform_0, window_bounds = array<i64: 1, 1>}, {transform_indices = @transform_1, window_bounds = array<i64: 8, 128>}, {pipeline_mode = #tpu.pipeline_mode<synchronous>, transform_indices = @transform_2, window_bounds = array<i64: 128, 128>}, {pipeline_mode = #tpu.pipeline_mode<synchronous>, transform_indices = @transform_3, window_bounds = array<i64: 1, 128>}, {transform_indices = @transform_4, window_bounds = array<i64: 8, 128>}]} {
    %c0 = arith.constant 0 : index
    %c0_0 = arith.constant 0 : index
    %0 = memref.load %arg1[%c0, %c0_0] : memref<1x1xf32, #tpu.memory_space<smem>>
    %c0_1 = arith.constant 0 : index
    %c0_2 = arith.constant 0 : index
    %1 = vector.load %arg2[%c0_1, %c0_2] : memref<8x128xf32, #tpu.memory_space<vmem>>, vector<8x128xf32>
    %c0_3 = arith.constant 0 : index
    %c0_4 = arith.constant 0 : index
    %2 = vector.load %arg3[%c0_3, %c0_4] : memref<128x128xf32, #tpu.memory_space<vmem>>, vector<128x128xf32>
    %cst = arith.constant dense<0.000000e+00> : vector<8x128xf32>
    %3 = tpu.matmul %1, %2, %cst {dimension_numbers = #tpu.dot_dimension_numbers<[1], [0], [0], [1], [0, 0, 1, 1], [], []>} : vector<8x128xf32>, vector<128x128xf32>, vector<8x128xf32> -> vector<8x128xf32>
    %c0_5 = arith.constant 0 : index
    %c0_6 = arith.constant 0 : index
    %4 = vector.load %arg4[%c0_5, %c0_6] : memref<1x128xf32, #tpu.memory_space<vmem>>, vector<1x128xf32>
    %5 = vector.broadcast %4 : vector<1x128xf32> to vector<8x128xf32>
    %6 = arith.addf %3, %5 : vector<8x128xf32>
    %7 = arith.subf %1, %6 : vector<8x128xf32>
    %8 = vector.broadcast %0 : f32 to vector<8x128xf32>
    %9 = arith.mulf %8, %7 : vector<8x128xf32>
    %10 = arith.addf %6, %9 : vector<8x128xf32>
    %c0_7 = arith.constant 0 : index
    %c0_8 = arith.constant 0 : index
    %11 = vector.load %arg5[%c0_7, %c0_8] : memref<8x128xf32, #tpu.memory_space<vmem>>, vector<8x128xf32>
    tpu.vector_store %arg5[%c0_7, %c0_8], %10 {strides = array<i32>} : memref<8x128xf32, #tpu.memory_space<vmem>>, vector<8x128xf32>,
    return
  }
  func.func @transform_0(%arg0: i32) -> (i32, i32) {
    %c0_i32 = arith.constant 0 : i32
    %c0_i32_0 = arith.constant 0 : i32
    %c0_i32_1 = arith.constant 0 : i32
    return %c0_i32, %c0_i32_0 : i32, i32
  }
  func.func @transform_1(%arg0: i32) -> (i32, i32) {
    %c0_i32 = arith.constant 0 : i32
    %c0_i32_0 = arith.constant 0 : i32
    return %arg0, %c0_i32 : i32, i32
  }
  func.func @transform_2(%arg0: i32) -> (i32, i32) {
    %c0_i32 = arith.constant 0 : i32
    %c0_i32_0 = arith.constant 0 : i32
    %c0_i32_1 = arith.constant 0 : i32
    return %c0_i32, %c0_i32_0 : i32, i32
  }
  func.func @transform_3(%arg0: i32) -> (i32, i32) {
    %c0_i32 = arith.constant 0 : i32
    %c0_i32_0 = arith.constant 0 : i32
    %c0_i32_1 = arith.constant 0 : i32
    return %c0_i32, %c0_i32_0 : i32, i32
  }
  func.func @transform_4(%arg0: i32) -> (i32, i32) {
    %c0_i32 = arith.constant 0 : i32
    %c0_i32_0 = arith.constant 0 : i32
    return %arg0, %c0_i32 : i32, i32
  }
}

</mosaic_0001>

<bundles_post_ra>
// kernel: tpu_custom_call.1
= control target key start
LH: loop header
LB: loop body
LE: loop exit
PB: predicated region body
PF: predicated region fallthrough
CT: control target
= control target key end

     0   :  { %s1041_s0 = inlined_call_operand.<no memory space> [shape: f32[1,1], index: 0, kind: input, shape index: {}]   ;;  %s1042_s1 = inlined_call_operand.hbm [shape: f32[16,128], index: 1, kind: input, shape index: {}]   ;;  %s1043_s2 = inlined_call_operand.hbm [shape: f32[128,128], index: 2, kind: input, shape index: {}]   ;;  %s1044_s3 = inlined_call_operand.hbm [shape: f32[1,128], index: 3, kind: input, shape index: {}]   ;;  %s1045_s4 = inlined_call_operand.hbm [shape: f32[16,128], index: 4, kind: output, shape index: {}]  }
   0x1   :  { %9 = sst [smem:[#allocation2]] %s1041_s0 }
   0x2   :  { %10 = vsyncpa [#allocation4], 0 }
   0x3   :  { %12 = vsyncpa [#allocation4 + $0x1], 0 }
   0x4   :  { %13 = vsyncpa [#allocation7], 0 }
   0x5   :  { %14 = vsyncpa [#allocation5], 0 }
   0x6   :  { %16 = vsyncpa [#allocation5 + $0x1], 0  ;;  %s804_s17 = smov 0   ;;  %s806_s18 = smov 0  }
   0x7   :  { %s808_s19 = smov 0   ;;  %s810_s20 = smov 0  }
   0x8 LB: > { %s825_s0 = sadd.s32 4294967295, %s765_s20   ;;  %s444_s21 = sadd.s32 4294967294, %s765_s20   ;;  %s765_s20 = sphi %s810_s20, %s1065_s20   ;;  %s761_s19 = sphi %s808_s19, %s1064_s19   ;;  %s757_s18 = sphi %s806_s18, %s1063_s18   ;;  %s753_s17 = sphi %s804_s17, %s1062_s17  }
   0x9   : > { %p63_p0 = scmp.ne.s32.totalorder %s757_s18, %s753_s17  ;;  %p1046_p1 = scmp.eq.s32.totalorder %s825_s0, 0 }
   0xa   : > { %p135_p3 = scmp.eq.s32.totalorder %s444_s21, 1  ;;  %p445_p5 = scmp.ge.s32.totalorder %s765_s20, 1 }
   0xb   : > { %p834_p4 = por %p1046_p1, %p63_p0  ;;  %p142_p7 = scmp.lt.s32.totalorder %s765_s20, 3 }
   0xc   : > { %p839_p6 = por %p135_p3, %p63_p0  ;;  %s767_s25 = smov [#allocation6]  }
   0xd   : > { %s1049_s22 = scalar_select %p834_p4, 1, 0 }
   0xe   : > { %s1050_s23 = scalar_select %p839_p6, 1, 0 }
   0xf   : > { %p844_p8 = pnand %p445_p5, %p142_p7  ;;  %s157_s26 = sshll.u32 %s767_s25, 4  ;;  %s848_s26 = int_to_ptr.vmem [resolvable:$true] %s157_s26 }
  0x10   : > { %s768_s28 = smov [#allocation8]   ;;  %s609_s6 = scalar_lea.hbm %s1043_s2, 2048 }
  0x11   : > { %p549_p9 = pneg %p844_p8  ;;  %s171_s29 = sshll.u32 %s768_s28, 4  ;;  %s859_s29 = int_to_ptr.vmem [resolvable:$true] %s171_s29 }
  0x12   : > { %p610_p12 = scmp.ne.s32.totalorder %s1043_s2, %s609_s6  ;;  %p616_p5 = scmp.lt.u32.totalorder %s609_s6, %s1043_s2 }
  0x13   : > { %p855_p11 = pnand %p549_p9, %p1046_p1 }
  0x15   : > { %p611_p13 = pneg %p855_p11 }
  0x17   : > { %p612_p0 = pnand %p611_p13, %p610_p12 }
  0x19   : > { %p613_p3 = pneg %p612_p0 }
  0x1b   : > { %p618_p7 = pnand %p616_p5, %p613_p3 }
  0x1d   : > { %621 = shalt.err (!%p618_p7)
}
  0x1e   : > { %s622_s11 = scalar_lea.vmem %s848_s26, 2048  ;;  %p630_p2 = scmp.lt.s32.totalorder %s848_s26, %s848_s26 }
  0x1f   : > { %p623_p9 = scmp.ne.s32.totalorder %s848_s26, %s622_s11  ;;  %p631_p12 = scmp.lt.s32.totalorder %s622_s11, %s622_s11 }
  0x21   : > { %p625_p10 = pnand %p623_p9, %p611_p13  ;;  %p632_p0 = por %p631_p12, %p630_p2 }
  0x23   : > { %p626_p1 = pneg %p625_p10 }
  0x25   : > { %p633_p6 = pnand %p632_p0, %p626_p1 }
  0x27   : > { %636 = shalt.err (!%p633_p6)
}
  0x28   : > { %s769_s12 = smov 128   ;;  %s770_s13 = smov 8  }
  0x29   : > { %552 = dma.hbm_to_vmem [thread:$0]  (!%p855_p11), %s1043_s2, 2048, %s848_s26, [#allocation7], %s769_s12, %s769_s12, %s770_s13  }
  0x2a   : > { %s637_s25 = scalar_lea.hbm %s1044_s3, 16 }
  0x2b   : > { %p638_p2 = scmp.ne.s32.totalorder %s1044_s3, %s637_s25  ;;  %p644_p10 = scmp.lt.u32.totalorder %s637_s25, %s1044_s3 }
  0x2d   : > { %p640_p1 = pnand %p638_p2, %p611_p13 }
  0x2f   : > { %p641_p6 = pneg %p640_p1 }
  0x31   : > { %p646_p3 = pnand %p644_p10, %p641_p6 }
  0x33   : > { %649 = shalt.err (!%p646_p3)
}
  0x34   : > { %s650_s26 = scalar_lea.vmem %s859_s29, 16  ;;  %s657_s7 = scalar_lea.vmem %s859_s29, 32 }
  0x35   : > { %p651_p5 = scmp.ne.s32.totalorder %s859_s29, %s650_s26  ;;  %p658_p12 = scmp.lt.s32.totalorder %s859_s29, %s859_s29 }
  0x36   : > { %p659_p0 = scmp.lt.s32.totalorder %s657_s7, %s650_s26 }
  0x37   : > { %p653_p7 = pnand %p651_p5, %p611_p13 }
  0x38   : > { %p660_p2 = por %p659_p0, %p658_p12 }
  0x39   : > { %p654_p9 = pneg %p653_p7 }
  0x3b   : > { %p661_p1 = pnand %p660_p2, %p654_p9 }
  0x3d   : > { %664 = shalt.err (!%p661_p1)
}
  0x3e   : > { %555 = dma.hbm_to_vmem [thread:$0]  (!%p855_p11), %s1044_s3, 16, %s859_s29, [#allocation7]  }
  0x3f   : > { %s915_s10 = sadd.s32 1, %s765_s20   ;;  %s50_s27 = sadd.s32 1, %s761_s19 }
  0x40   : > { %s47_s11 = ssub.s32 %s765_s20, %s915_s10  ;;  %p57_p13 = scmp.ne.s32.totalorder %s761_s19, %s757_s18 }
  0x41   : > { %p48_p6 = scmp.eq.s32.totalorder %s47_s11, 0  ;;  %p58_p10 = scmp.eq.s32.totalorder %s765_s20, 0 }
  0x42   : > { %p1053_p3 = scmp.eq.s32.totalorder %s825_s0, 1  ;;  %p566_p7 = scmp.lt.s32.totalorder %s765_s20, 2 }
  0x43   : > { %s931_s13 = scalar_select %p48_p6, %s761_s19, %s50_s27  }
  0x44   : > { %p925_p5 = por %p1053_p3, %p57_p13  ;;  %p59_p9 = por %p58_p10, %p57_p13 }
  0x45   : > { %s182_s14 = sand.u32 1, %s761_s19   ;;  %s450_s29 = sshll.u32 %s765_s20, 7 }
  0x46   : > { %s1054_s12 = scalar_select %p925_p5, 1, 0 }
  0x47   : > { %s449_s15 = sshll.u32 %s182_s14, 3  ;;  %s938_s25 = scalar_lea.hbm %s1042_s1, %s450_s29 }
  0x48   : > { %s186_s28 = scalar_lea.vmem [#allocation3], %s449_s15  ;;  %p942_p11 = pnand %p566_p7, %p59_p9 }
  0x49   : > { %s193_s30 = sshll.u32 %s186_s28, 4  ;;  %s183_s6 = scalar_lea.sflag [#allocation4], %s182_s14  ;;  %s940_s30 = int_to_ptr.vmem [resolvable:$true] %s193_s30 }
  0x4a   : > { %s665_s26 = scalar_lea.hbm %s938_s25, 128  ;;  %p667_p0 = pneg %p942_p11 }
  0x4b   : > { %p666_p12 = scmp.ne.s32.totalorder %s938_s25, %s665_s26  ;;  %s670_s9 = scalar_lea.hbm %s1042_s1, 256 }
  0x4c   : > { %p671_p13 = scmp.lt.u32.totalorder %s938_s25, %s1042_s1  ;;  %p672_p6 = scmp.lt.u32.totalorder %s670_s9, %s665_s26 }
  0x4d   : > { %p668_p2 = pnand %p667_p0, %p666_p12  ;;  %p674_p3 = scmp.lt.u32.totalorder %s665_s26, %s938_s25 }
  0x4e   : > { %p673_p10 = por %p672_p6, %p671_p13 }
  0x4f   : > { %p669_p1 = pneg %p668_p2 }
  0x50   : > { %p675_p7 = por %p674_p3, %p673_p10 }
  0x52   : > { %p676_p9 = pnand %p675_p7, %p669_p1 }
  0x54   : > { %679 = shalt.err (!%p676_p9)
}
  0x55   : > { %s680_s14 = scalar_lea.vmem %s940_s30, 128  ;;  %s771_s15 = smov [#allocation3]  }
  0x56   : > { %p681_p12 = scmp.ne.s32.totalorder %s940_s30, %s680_s14  ;;  %s685_s29 = sshll.u32 %s771_s15, 4  ;;  %s686_s29 = int_to_ptr.vmem [resolvable:$false] %s685_s29 }
  0x57   : > { %s687_s16 = scalar_lea.vmem %s686_s29, 256  ;;  %p688_p4 = scmp.lt.s32.totalorder %s940_s30, %s686_s29 }
  0x58   : > { %p683_p2 = pnand %p681_p12, %p667_p0  ;;  %p689_p13 = scmp.lt.s32.totalorder %s687_s16, %s680_s14 }
  0x5a   : > { %p684_p5 = pneg %p683_p2  ;;  %p690_p6 = por %p689_p13, %p688_p4 }
  0x5c   : > { %p691_p10 = pnand %p690_p6, %p684_p5 }
  0x5e   : > { %694 = shalt.err (!%p691_p10)
}
  0x5f   : > { %559 = dma.hbm_to_vmem [thread:$0]  (!%p942_p11), %s938_s25, 128, %s940_s30, %s183_s6  }
  0x60   : > { %202 = sbr.rel (%p844_p8) target bundleno = 375 (0x177), region = 36  ;;  %s974_s21 = sand.u32 (!%p844_p8), 1, %s757_s18  }
  0x61   : > { %s452_s28 = sshll.u32 (!%p844_p8), %s974_s21, 3  ;;  %s205_s26 = scalar_lea.sflag (!%p844_p8), [#allocation4], %s974_s21 }
  0x62   : > { %s980_s7 = scalar_lea.vmem (!%p844_p8), [#allocation3], %s452_s28  ;;  %p1056_p4 = scmp.ne.s32.totalorder (!%p844_p8), %s1049_s22, 0 }
  0x67   : > { %740 = dma.done.wait (%p1056_p4), %s205_s26, 128  }
  0x68   : > { %742 = vsyncadd (%p1056_p4), %s205_s26, 4294967168  ;;  %p1057_p5 = scmp.eq.s32.totalorder %s825_s0, 0 }
  0x6a   : > { %744 = dma.done.wait (%p1057_p5), [#allocation7], 2064   ;;  %p1058_p8 = pmov %p1057_p5 }
  0x6b   : > { %v772_v0 = vmov 0.0|0.0   ;;  %vm773_vm0 = vmmov 0   ;;  %v774_v1 = vmov 0.0   ;;  %v243_v2 = vld [vmem:[#allocation6] sm:$0xff]  ;;  %v244_v3 = vld [vmem:[#allocation6 + $0x8] sm:$0xff]  ;;  %v245_v4 = vld [vmem:[#allocation6 + $0x10] sm:$0xff] }
  0x6c   : > { %746 = vsyncadd (%p1058_p8), [#allocation7], 4294965232  ;;  %513 = vmatprep.subr.bf16.mxu0 %v772_v0  ;;  %510 = vmatprep.mubr.msk.f32.mxu0 %vm773_vm0, %v774_v1  ;;  %v514_v5 = vpack.c.bf16 %v244_v3, %v243_v2  ;;  %v246_v6 = vld [vmem:[#allocation6 + $0x18] sm:$0xff]  ;;  %v247_v8 = vld [vmem:[#allocation6 + $0x20] sm:$0xff]  ;;  %s241_s22 = sld [smem:[#allocation2]]  ;;  %s458_s24 = sshll.u32 %s825_s0, 7 }
  0x6d   : > { %v517_v7 = vpack.c.bf16 %v246_v6, %v245_v4  ;;  %v248_v9 = vld [vmem:[#allocation6 + $0x28] sm:$0xff]  ;;  %v249_v11 = vld [vmem:[#allocation6 + $0x30] sm:$0xff]  ;;  %v250_v12 = vld [vmem:[#allocation6 + $0x38] sm:$0xff]  ;;  %s240_s25 = scalar_lea.vmem [#allocation9], %s452_s28  ;;  %s997_s8 = scalar_lea.hbm %s1045_s4, %s458_s24 }
  0x6e   : > { %515 = vmatpush3.bf16.msra.mxu0 %v514_v5  ;;  %v520_v10 = vpack.c.bf16 %v248_v9, %v247_v8  ;;  %v523_v13 = vpack.c.bf16 %v250_v12, %v249_v11  ;;  %v251_v14 = vld [vmem:[#allocation6 + $0x40] sm:$0xff]  ;;  %v252_v15 = vld [vmem:[#allocation6 + $0x48] sm:$0xff]  ;;  %v253_v17 = vld [vmem:[#allocation6 + $0x50] sm:$0xff]  ;;  %s355_s30 = sshll.u32 %s240_s25, 4  ;;  %s342_s9 = scalar_lea.sflag [#allocation5], %s974_s21  ;;  %s999_s30 = int_to_ptr.vmem [resolvable:$true] %s355_s30 }
  0x6f   : > { %516 = vmatprep.subr.bf16.mxu0 %v772_v0  ;;  %v526_v16 = vpack.c.bf16 %v252_v15, %v251_v14  ;;  %v254_v18 = vld [vmem:[#allocation6 + $0x58] sm:$0xff]  ;;  %v255_v20 = vld [vmem:[#allocation6 + $0x60] sm:$0xff]  ;;  %v256_v21 = vld [vmem:[#allocation6 + $0x68] sm:$0xff]  ;;  %s695_s27 = scalar_lea.vmem %s999_s30, 128  ;;  %p1059_p0 = scmp.ne.s32.totalorder %s1054_s12, 0 }
  0x70   : > { %v529_v19 = vpack.c.bf16 %v254_v18, %v253_v17  ;;  %v532_v22 = vpack.c.bf16 %v256_v21, %v255_v20  ;;  %v257_v23 = vld [vmem:[#allocation6 + $0x70] sm:$0xff]  ;;  %v258_v24 = vld [vmem:[#allocation6 + $0x78] sm:$0xff]  ;;  %v456_v27 = vld [vmem:[#allocation8] ss:$0 sm:$0xff]  ;;  %p696_p11 = scmp.ne.s32.totalorder %s999_s30, %s695_s27  ;;  %s775_s0 = smov [#allocation9]  }
  0x71   : > { %v535_v25 = vpack.c.bf16 %v258_v24, %v257_v23  ;;  %v242_v26 = vld [vmem:[%s980_s7] sm:$0xff]  ;;  %s699_s11 = sshll.u32 %s775_s0, 4  ;;  %s700_s11 = int_to_ptr.vmem [resolvable:$false] %s699_s11 }
  0x72   : > { %518 = vmatpush3.bf16.msra.mxu0 %v517_v7  ;;  %v337_v31 = vstv %s241_s22  ;;  %p697_p1 = pnand %p696_p11, %p1059_p0  ;;  %s701_s14 = scalar_lea.vmem %s700_s11, 256 }
  0x73   : > { %519 = vmatprep.subr.bf16.mxu0 %v772_v0  ;;  %p702_p7 = scmp.lt.s32.totalorder %s999_s30, %s700_s11  ;;  %p703_p9 = scmp.lt.s32.totalorder %s701_s14, %s695_s27 }
  0x74   : > { %p698_p3 = pneg %p697_p1 }
  0x75   : > { %p704_p12 = por %p703_p9, %p702_p7 }
  0x76   : > { %521 = vmatpush3.bf16.msra.mxu0 %v520_v10 }
  0x77   : > { %522 = vmatprep.subr.bf16.mxu0 %v772_v0  ;;  %p705_p2 = pnand %p704_p12, %p698_p3 }
  0x7a   : > { %524 = vmatpush3.bf16.msra.mxu0 %v523_v13 }
  0x7b   : > { %525 = vmatprep.subr.bf16.mxu0 %v772_v0 }
  0x7e   : > { %527 = vmatpush3.bf16.msra.mxu0 %v526_v16 }
  0x7f   : > { %528 = vmatprep.subr.bf16.mxu0 %v772_v0 }
  0x82   : > { %530 = vmatpush3.bf16.msra.mxu0 %v529_v19 }
  0x83   : > { %531 = vmatprep.subr.bf16.mxu0 %v772_v0 }
  0x86   : > { %533 = vmatpush3.bf16.msra.mxu0 %v532_v22 }
  0x87   : > { %534 = vmatprep.subr.bf16.mxu0 %v772_v0 }
  0x8a   : > { %536 = vmatpush3.bf16.msra.mxu0 %v535_v25 }
  0x8d   : > { %511 = vmatmul.mubr.f32.vlgmr.msra.gmra.mrb[0].mxu0 %v242_v26 }
 0x160   : > { %v332_v28 = vpop.f32.mrb[0].mxu0 }
 0x161   : > { %v333_v29 = vadd.f32 %v456_v27, %v332_v28  ;;  %v512_v30 = vpop.f32.mrb[1].mxu0 }
 0x163   : > { %v336_v32 = vsub.f32 %v242_v26, %v333_v29 }
 0x165   : > { %v338_v33 = vmul.f32 %v337_v31, %v336_v32 }
 0x167   : > { %v339_v34 = vadd.f32 %v338_v33, %v333_v29 }
 0x169   : > { %340 = vst [vmem:[%s240_s25] sm:$0xff] %v339_v34 }
 0x16a   : > { %708 = shalt.err (!%p705_p2)
}
 0x16b   : > { %s709_s15 = scalar_lea.hbm %s997_s8, 128  ;;  %s713_s21 = scalar_lea.hbm %s1045_s4, 256 }
 0x16c   : > { %p710_p13 = scmp.ne.s32.totalorder %s997_s8, %s709_s15  ;;  %p714_p4 = scmp.lt.u32.totalorder %s997_s8, %s1045_s4 }
 0x16d   : > { %p715_p5 = scmp.lt.u32.totalorder %s713_s21, %s709_s15  ;;  %p717_p11 = scmp.lt.u32.totalorder %s709_s15, %s997_s8 }
 0x16e   : > { %p711_p6 = pnand %p710_p13, %p1059_p0 }
 0x16f   : > { %p716_p8 = por %p715_p5, %p714_p4 }
 0x170   : > { %p712_p10 = pneg %p711_p6 }
 0x171   : > { %p718_p1 = por %p717_p11, %p716_p8 }
 0x173   : > { %p719_p3 = pnand %p718_p1, %p712_p10 }
 0x175   : > { %722 = shalt.err (!%p719_p3)
}
 0x176   : > { %547 = dma.vmem_to_hbm [thread:$0]  (%p1059_p0), %s999_s30, 128, %s997_s8, %s342_s9  }
 0x177 PF: > { %s367_s7 = sand.u32 1, %s753_s17   ;;  %p1060_p7 = scmp.ne.s32.totalorder %s1050_s23, 0 }
 0x178   : > { %p1061_p9 = scmp.ge.s32.totalorder %s765_s20, 2  ;;  %s368_s22 = scalar_lea.sflag [#allocation5], %s367_s7 }
 0x17a   : > { %p561_p12 = pnand %p1061_p9, %p1060_p7 }
 0x17c   : > { %748 = dma.done.wait (!%p561_p12), %s368_s22, 128  }
 0x17d   : > { %750 = vsyncadd (!%p561_p12), %s368_s22, 4294967168  ;;  %p19_p2 = scmp.ge.s32.totalorder %s915_s10, 4   ;;  %s1062_s17 = smov %s757_s18 }
 0x17e   : > { %s1063_s18 = smov %s761_s19  ;;  %s1064_s19 = smov %s931_s13 }
 0x17f   : > { %s1065_s20 = smov %s915_s10  ;;  %21 = sbr.rel (!%p19_p2) target bundleno = 8 (0x8), region = 89 }
 0x186   :  { %373 = vsyncpa [#allocation4], 1 }
 0x187   :  { %375 = vsyncpa [#allocation4 + $0x1], 1 }
 0x188   :  { %376 = vsyncpa [#allocation7], 1 }
 0x189   :  { %377 = vsyncpa [#allocation5], 1 }
 0x18a   :  { %379 = vsyncpa [#allocation5 + $0x1], 1 }

// kernel: tpu_custom_call.1
= control target key start
LH: loop header
LB: loop body
LE: loop exit
PB: predicated region body
PF: predicated region fallthrough
CT: control target
= control target key end

     0   :  { %s1041_s0 = inlined_call_operand.<no memory space> [shape: f32[1,1], index: 0, kind: input, shape index: {}]   ;;  %s1042_s1 = inlined_call_operand.hbm [shape: f32[16,128], index: 1, kind: input, shape index: {}]   ;;  %s1043_s2 = inlined_call_operand.hbm [shape: f32[128,128], index: 2, kind: input, shape index: {}]   ;;  %s1044_s3 = inlined_call_operand.hbm [shape: f32[1,128], index: 3, kind: input, shape index: {}]   ;;  %s1045_s4 = inlined_call_operand.hbm [shape: f32[16,128], index: 4, kind: output, shape index: {}]  }
   0x1   :  { %9 = sst [smem:[#allocation2]] %s1041_s0 }
   0x2   :  { %10 = vsyncpa [#allocation4], 0 }
   0x3   :  { %12 = vsyncpa [#allocation4 + $0x1], 0 }
   0x4   :  { %13 = vsyncpa [#allocation7], 0 }
   0x5   :  { %14 = vsyncpa [#allocation5], 0 }
   0x6   :  { %16 = vsyncpa [#allocation5 + $0x1], 0  ;;  %s804_s17 = smov 0   ;;  %s806_s18 = smov 0  }
   0x7   :  { %s808_s19 = smov 0   ;;  %s810_s20 = smov 0  }
   0x8 LB: > { %s825_s0 = sadd.s32 4294967295, %s765_s20   ;;  %s444_s21 = sadd.s32 4294967294, %s765_s20   ;;  %s765_s20 = sphi %s810_s20, %s1065_s20   ;;  %s761_s19 = sphi %s808_s19, %s1064_s19   ;;  %s757_s18 = sphi %s806_s18, %s1063_s18   ;;  %s753_s17 = sphi %s804_s17, %s1062_s17  }
   0x9   : > { %p63_p0 = scmp.ne.s32.totalorder %s757_s18, %s753_s17  ;;  %p1046_p1 = scmp.eq.s32.totalorder %s825_s0, 0 }
   0xa   : > { %p135_p3 = scmp.eq.s32.totalorder %s444_s21, 1  ;;  %p445_p5 = scmp.ge.s32.totalorder %s765_s20, 1 }
   0xb   : > { %p834_p4 = por %p1046_p1, %p63_p0  ;;  %p142_p7 = scmp.lt.s32.totalorder %s765_s20, 3 }
   0xc   : > { %p839_p6 = por %p135_p3, %p63_p0  ;;  %s767_s25 = smov [#allocation6]  }
   0xd   : > { %s1049_s22 = scalar_select %p834_p4, 1, 0 }
   0xe   : > { %s1050_s23 = scalar_select %p839_p6, 1, 0 }
   0xf   : > { %p844_p8 = pnand %p445_p5, %p142_p7  ;;  %s157_s26 = sshll.u32 %s767_s25, 4  ;;  %s848_s26 = int_to_ptr.vmem [resolvable:$true] %s157_s26 }
  0x10   : > { %s768_s28 = smov [#allocation8]   ;;  %s609_s6 = scalar_lea.hbm %s1043_s2, 2048 }
  0x11   : > { %p549_p9 = pneg %p844_p8  ;;  %s171_s29 = sshll.u32 %s768_s28, 4  ;;  %s859_s29 = int_to_ptr.vmem [resolvable:$true] %s171_s29 }
  0x12   : > { %p610_p12 = scmp.ne.s32.totalorder %s1043_s2, %s609_s6  ;;  %p616_p5 = scmp.lt.u32.totalorder %s609_s6, %s1043_s2 }
  0x13   : > { %p855_p11 = pnand %p549_p9, %p1046_p1 }
  0x15   : > { %p611_p13 = pneg %p855_p11 }
  0x17   : > { %p612_p0 = pnand %p611_p13, %p610_p12 }
  0x19   : > { %p613_p3 = pneg %p612_p0 }
  0x1b   : > { %p618_p7 = pnand %p616_p5, %p613_p3 }
  0x1d   : > { %621 = shalt.err (!%p618_p7)
}
  0x1e   : > { %s622_s11 = scalar_lea.vmem %s848_s26, 2048  ;;  %p630_p2 = scmp.lt.s32.totalorder %s848_s26, %s848_s26 }
  0x1f   : > { %p623_p9 = scmp.ne.s32.totalorder %s848_s26, %s622_s11  ;;  %p631_p12 = scmp.lt.s32.totalorder %s622_s11, %s622_s11 }
  0x21   : > { %p625_p10 = pnand %p623_p9, %p611_p13  ;;  %p632_p0 = por %p631_p12, %p630_p2 }
  0x23   : > { %p626_p1 = pneg %p625_p10 }
  0x25   : > { %p633_p6 = pnand %p632_p0, %p626_p1 }
  0x27   : > { %636 = shalt.err (!%p633_p6)
}
  0x28   : > { %s769_s12 = smov 128   ;;  %s770_s13 = smov 8  }
  0x29   : > { %552 = dma.hbm_to_vmem [thread:$0]  (!%p855_p11), %s1043_s2, 2048, %s848_s26, [#allocation7], %s769_s12, %s769_s12, %s770_s13  }
  0x2a   : > { %s637_s25 = scalar_lea.hbm %s1044_s3, 16 }
  0x2b   : > { %p638_p2 = scmp.ne.s32.totalorder %s1044_s3, %s637_s25  ;;  %p644_p10 = scmp.lt.u32.totalorder %s637_s25, %s1044_s3 }
  0x2d   : > { %p640_p1 = pnand %p638_p2, %p611_p13 }
  0x2f   : > { %p641_p6 = pneg %p640_p1 }
  0x31   : > { %p646_p3 = pnand %p644_p10, %p641_p6 }
  0x33   : > { %649 = shalt.err (!%p646_p3)
}
  0x34   : > { %s650_s26 = scalar_lea.vmem %s859_s29, 16  ;;  %s657_s7 = scalar_lea.vmem %s859_s29, 32 }
  0x35   : > { %p651_p5 = scmp.ne.s32.totalorder %s859_s29, %s650_s26  ;;  %p658_p12 = scmp.lt.s32.totalorder %s859_s29, %s859_s29 }
  0x36   : > { %p659_p0 = scmp.lt.s32.totalorder %s657_s7, %s650_s26 }
  0x37   : > { %p653_p7 = pnand %p651_p5, %p611_p13 }
  0x38   : > { %p660_p2 = por %p659_p0, %p658_p12 }
  0x39   : > { %p654_p9 = pneg %p653_p7 }
  0x3b   : > { %p661_p1 = pnand %p660_p2, %p654_p9 }
  0x3d   : > { %664 = shalt.err (!%p661_p1)
}
  0x3e   : > { %555 = dma.hbm_to_vmem [thread:$0]  (!%p855_p11), %s1044_s3, 16, %s859_s29, [#allocation7]  }
  0x3f   : > { %s915_s10 = sadd.s32 1, %s765_s20   ;;  %s50_s27 = sadd.s32 1, %s761_s19 }
  0x40   : > { %s47_s11 = ssub.s32 %s765_s20, %s915_s10  ;;  %p57_p13 = scmp.ne.s32.totalorder %s761_s19, %s757_s18 }
  0x41   : > { %p48_p6 = scmp.eq.s32.totalorder %s47_s11, 0  ;;  %p58_p10 = scmp.eq.s32.totalorder %s765_s20, 0 }
  0x42   : > { %p1053_p3 = scmp.eq.s32.totalorder %s825_s0, 1  ;;  %p566_p7 = scmp.lt.s32.totalorder %s765_s20, 2 }
  0x43   : > { %s931_s13 = scalar_select %p48_p6, %s761_s19, %s50_s27  }
  0x44   : > { %p925_p5 = por %p1053_p3, %p57_p13  ;;  %p59_p9 = por %p58_p10, %p57_p13 }
  0x45   : > { %s182_s14 = sand.u32 1, %s761_s19   ;;  %s450_s29 = sshll.u32 %s765_s20, 7 }
  0x46   : > { %s1054_s12 = scalar_select %p925_p5, 1, 0 }
  0x47   : > { %s449_s15 = sshll.u32 %s182_s14, 3  ;;  %s938_s25 = scalar_lea.hbm %s1042_s1, %s450_s29 }
  0x48   : > { %s186_s28 = scalar_lea.vmem [#allocation3], %s449_s15  ;;  %p942_p11 = pnand %p566_p7, %p59_p9 }
  0x49   : > { %s193_s30 = sshll.u32 %s186_s28, 4  ;;  %s183_s6 = scalar_lea.sflag [#allocation4], %s182_s14  ;;  %s940_s30 = int_to_ptr.vmem [resolvable:$true] %s193_s30 }
  0x4a   : > { %s665_s26 = scalar_lea.hbm %s938_s25, 128  ;;  %p667_p0 = pneg %p942_p11 }
  0x4b   : > { %p666_p12 = scmp.ne.s32.totalorder %s938_s25, %s665_s26  ;;  %s670_s9 = scalar_lea.hbm %s1042_s1, 256 }
  0x4c   : > { %p671_p13 = scmp.lt.u32.totalorder %s938_s25, %s1042_s1  ;;  %p672_p6 = scmp.lt.u32.totalorder %s670_s9, %s665_s26 }
  0x4d   : > { %p668_p2 = pnand %p667_p0, %p666_p12  ;;  %p674_p3 = scmp.lt.u32.totalorder %s665_s26, %s938_s25 }
  0x4e   : > { %p673_p10 = por %p672_p6, %p671_p13 }
  0x4f   : > { %p669_p1 = pneg %p668_p2 }
  0x50   : > { %p675_p7 = por %p674_p3, %p673_p10 }
  0x52   : > { %p676_p9 = pnand %p675_p7, %p669_p1 }
  0x54   : > { %679 = shalt.err (!%p676_p9)
}
  0x55   : > { %s680_s14 = scalar_lea.vmem %s940_s30, 128  ;;  %s771_s15 = smov [#allocation3]  }
  0x56   : > { %p681_p12 = scmp.ne.s32.totalorder %s940_s30, %s680_s14  ;;  %s685_s29 = sshll.u32 %s771_s15, 4  ;;  %s686_s29 = int_to_ptr.vmem [resolvable:$false] %s685_s29 }
  0x57   : > { %s687_s16 = scalar_lea.vmem %s686_s29, 256  ;;  %p688_p4 = scmp.lt.s32.totalorder %s940_s30, %s686_s29 }
  0x58   : > { %p683_p2 = pnand %p681_p12, %p667_p0  ;;  %p689_p13 = scmp.lt.s32.totalorder %s687_s16, %s680_s14 }
  0x5a   : > { %p684_p5 = pneg %p683_p2  ;;  %p690_p6 = por %p689_p13, %p688_p4 }
  0x5c   : > { %p691_p10 = pnand %p690_p6, %p684_p5 }
  0x5e   : > { %694 = shalt.err (!%p691_p10)
}
  0x5f   : > { %559 = dma.hbm_to_vmem [thread:$0]  (!%p942_p11), %s938_s25, 128, %s940_s30, %s183_s6  }
  0x60   : > { %202 = sbr.rel (%p844_p8) target bundleno = 375 (0x177), region = 36  ;;  %s974_s21 = sand.u32 (!%p844_p8), 1, %s757_s18  }
  0x61   : > { %s452_s28 = sshll.u32 (!%p844_p8), %s974_s21, 3  ;;  %s205_s26 = scalar_lea.sflag (!%p844_p8), [#allocation4], %s974_s21 }
  0x62   : > { %s980_s7 = scalar_lea.vmem (!%p844_p8), [#allocation3], %s452_s28  ;;  %p1056_p4 = scmp.ne.s32.totalorder (!%p844_p8), %s1049_s22, 0 }
  0x67   : > { %740 = dma.done.wait (%p1056_p4), %s205_s26, 128  }
  0x68   : > { %742 = vsyncadd (%p1056_p4), %s205_s26, 4294967168  ;;  %p1057_p5 = scmp.eq.s32.totalorder %s825_s0, 0 }
  0x6a   : > { %744 = dma.done.wait (%p1057_p5), [#allocation7], 2064   ;;  %p1058_p8 = pmov %p1057_p5 }
  0x6b   : > { %v772_v0 = vmov 0.0|0.0   ;;  %vm773_vm0 = vmmov 0   ;;  %v774_v1 = vmov 0.0   ;;  %v243_v2 = vld [vmem:[#allocation6] sm:$0xff]  ;;  %v244_v3 = vld [vmem:[#allocation6 + $0x8] sm:$0xff]  ;;  %v245_v4 = vld [vmem:[#allocation6 + $0x10] sm:$0xff] }
  0x6c   : > { %746 = vsyncadd (%p1058_p8), [#allocation7], 4294965232  ;;  %513 = vmatprep.subr.bf16.mxu0 %v772_v0  ;;  %510 = vmatprep.mubr.msk.f32.mxu0 %vm773_vm0, %v774_v1  ;;  %v514_v5 = vpack.c.bf16 %v244_v3, %v243_v2  ;;  %v246_v6 = vld [vmem:[#allocation6 + $0x18] sm:$0xff]  ;;  %v247_v8 = vld [vmem:[#allocation6 + $0x20] sm:$0xff]  ;;  %s241_s22 = sld [smem:[#allocation2]]  ;;  %s458_s24 = sshll.u32 %s825_s0, 7 }
  0x6d   : > { %v517_v7 = vpack.c.bf16 %v246_v6, %v245_v4  ;;  %v248_v9 = vld [vmem:[#allocation6 + $0x28] sm:$0xff]  ;;  %v249_v11 = vld [vmem:[#allocation6 + $0x30] sm:$0xff]  ;;  %v250_v12 = vld [vmem:[#allocation6 + $0x38] sm:$0xff]  ;;  %s240_s25 = scalar_lea.vmem [#allocation9], %s452_s28  ;;  %s997_s8 = scalar_lea.hbm %s1045_s4, %s458_s24 }
  0x6e   : > { %515 = vmatpush3.bf16.msra.mxu0 %v514_v5  ;;  %v520_v10 = vpack.c.bf16 %v248_v9, %v247_v8  ;;  %v523_v13 = vpack.c.bf16 %v250_v12, %v249_v11  ;;  %v251_v14 = vld [vmem:[#allocation6 + $0x40] sm:$0xff]  ;;  %v252_v15 = vld [vmem:[#allocation6 + $0x48] sm:$0xff]  ;;  %v253_v17 = vld [vmem:[#allocation6 + $0x50] sm:$0xff]  ;;  %s355_s30 = sshll.u32 %s240_s25, 4  ;;  %s342_s9 = scalar_lea.sflag [#allocation5], %s974_s21  ;;  %s999_s30 = int_to_ptr.vmem [resolvable:$true] %s355_s30 }
  0x6f   : > { %516 = vmatprep.subr.bf16.mxu0 %v772_v0  ;;  %v526_v16 = vpack.c.bf16 %v252_v15, %v251_v14  ;;  %v254_v18 = vld [vmem:[#allocation6 + $0x58] sm:$0xff]  ;;  %v255_v20 = vld [vmem:[#allocation6 + $0x60] sm:$0xff]  ;;  %v256_v21 = vld [vmem:[#allocation6 + $0x68] sm:$0xff]  ;;  %s695_s27 = scalar_lea.vmem %s999_s30, 128  ;;  %p1059_p0 = scmp.ne.s32.totalorder %s1054_s12, 0 }
  0x70   : > { %v529_v19 = vpack.c.bf16 %v254_v18, %v253_v17  ;;  %v532_v22 = vpack.c.bf16 %v256_v21, %v255_v20  ;;  %v257_v23 = vld [vmem:[#allocation6 + $0x70] sm:$0xff]  ;;  %v258_v24 = vld [vmem:[#allocation6 + $0x78] sm:$0xff]  ;;  %v456_v27 = vld [vmem:[#allocation8] ss:$0 sm:$0xff]  ;;  %p696_p11 = scmp.ne.s32.totalorder %s999_s30, %s695_s27  ;;  %s775_s0 = smov [#allocation9]  }
  0x71   : > { %v535_v25 = vpack.c.bf16 %v258_v24, %v257_v23  ;;  %v242_v26 = vld [vmem:[%s980_s7] sm:$0xff]  ;;  %s699_s11 = sshll.u32 %s775_s0, 4  ;;  %s700_s11 = int_to_ptr.vmem [resolvable:$false] %s699_s11 }
  0x72   : > { %518 = vmatpush3.bf16.msra.mxu0 %v517_v7  ;;  %v337_v31 = vstv %s241_s22  ;;  %p697_p1 = pnand %p696_p11, %p1059_p0  ;;  %s701_s14 = scalar_lea.vmem %s700_s11, 256 }
  0x73   : > { %519 = vmatprep.subr.bf16.mxu0 %v772_v0  ;;  %p702_p7 = scmp.lt.s32.totalorder %s999_s30, %s700_s11  ;;  %p703_p9 = scmp.lt.s32.totalorder %s701_s14, %s695_s27 }
  0x74   : > { %p698_p3 = pneg %p697_p1 }
  0x75   : > { %p704_p12 = por %p703_p9, %p702_p7 }
  0x76   : > { %521 = vmatpush3.bf16.msra.mxu0 %v520_v10 }
  0x77   : > { %522 = vmatprep.subr.bf16.mxu0 %v772_v0  ;;  %p705_p2 = pnand %p704_p12, %p698_p3 }
  0x7a   : > { %524 = vmatpush3.bf16.msra.mxu0 %v523_v13 }
  0x7b   : > { %525 = vmatprep.subr.bf16.mxu0 %v772_v0 }
  0x7e   : > { %527 = vmatpush3.bf16.msra.mxu0 %v526_v16 }
  0x7f   : > { %528 = vmatprep.subr.bf16.mxu0 %v772_v0 }
  0x82   : > { %530 = vmatpush3.bf16.msra.mxu0 %v529_v19 }
  0x83   : > { %531 = vmatprep.subr.bf16.mxu0 %v772_v0 }
  0x86   : > { %533 = vmatpush3.bf16.msra.mxu0 %v532_v22 }
  0x87   : > { %534 = vmatprep.subr.bf16.mxu0 %v772_v0 }
  0x8a   : > { %536 = vmatpush3.bf16.msra.mxu0 %v535_v25 }
  0x8d   : > { %511 = vmatmul.mubr.f32.vlgmr.msra.gmra.mrb[0].mxu0 %v242_v26 }
 0x160   : > { %v332_v28 = vpop.f32.mrb[0].mxu0 }
 0x161   : > { %v333_v29 = vadd.f32 %v456_v27, %v332_v28  ;;  %v512_v30 = vpop.f32.mrb[1].mxu0 }
 0x163   : > { %v336_v32 = vsub.f32 %v242_v26, %v333_v29 }
 0x165   : > { %v338_v33 = vmul.f32 %v337_v31, %v336_v32 }
 0x167   : > { %v339_v34 = vadd.f32 %v338_v33, %v333_v29 }
 0x169   : > { %340 = vst [vmem:[%s240_s25] sm:$0xff] %v339_v34 }
 0x16a   : > { %708 = shalt.err (!%p705_p2)
}
 0x16b   : > { %s709_s15 = scalar_lea.hbm %s997_s8, 128  ;;  %s713_s21 = scalar_lea.hbm %s1045_s4, 256 }
 0x16c   : > { %p710_p13 = scmp.ne.s32.totalorder %s997_s8, %s709_s15  ;;  %p714_p4 = scmp.lt.u32.totalorder %s997_s8, %s1045_s4 }
 0x16d   : > { %p715_p5 = scmp.lt.u32.totalorder %s713_s21, %s709_s15  ;;  %p717_p11 = scmp.lt.u32.totalorder %s709_s15, %s997_s8 }
 0x16e   : > { %p711_p6 = pnand %p710_p13, %p1059_p0 }
 0x16f   : > { %p716_p8 = por %p715_p5, %p714_p4 }
 0x170   : > { %p712_p10 = pneg %p711_p6 }
 0x171   : > { %p718_p1 = por %p717_p11, %p716_p8 }
 0x173   : > { %p719_p3 = pnand %p718_p1, %p712_p10 }
 0x175   : > { %722 = shalt.err (!%p719_p3)
}
 0x176   : > { %547 = dma.vmem_to_hbm [thread:$0]  (%p1059_p0), %s999_s30, 128, %s997_s8, %s342_s9  }
 0x177 PF: > { %s367_s7 = sand.u32 1, %s753_s17   ;;  %p1060_p7 = scmp.ne.s32.totalorder %s1050_s23, 0 }
 0x178   : > { %p1061_p9 = scmp.ge.s32.totalorder %s765_s20, 2  ;;  %s368_s22 = scalar_lea.sflag [#allocation5], %s367_s7 }
 0x17a   : > { %p561_p12 = pnand %p1061_p9, %p1060_p7 }
 0x17c   : > { %748 = dma.done.wait (!%p561_p12), %s368_s22, 128  }
 0x17d   : > { %750 = vsyncadd (!%p561_p12), %s368_s22, 4294967168  ;;  %p19_p2 = scmp.ge.s32.totalorder %s915_s10, 4   ;;  %s1062_s17 = smov %s757_s18 }
 0x17e   : > { %s1063_s18 = smov %s761_s19  ;;  %s1064_s19 = smov %s931_s13 }
 0x17f   : > { %s1065_s20 = smov %s915_s10  ;;  %21 = sbr.rel (!%p19_p2) target bundleno = 8 (0x8), region = 89 }
 0x186   :  { %373 = vsyncpa [#allocation4], 1 }
 0x187   :  { %375 = vsyncpa [#allocation4 + $0x1], 1 }
 0x188   :  { %376 = vsyncpa [#allocation7], 1 }
 0x189   :  { %377 = vsyncpa [#allocation5], 1 }
 0x18a   :  { %379 = vsyncpa [#allocation5 + $0x1], 1 }

</bundles_post_ra>
